<compile_context>
chip_gen: v5e
topology: v5e:2x2
jax: 0.10.0
libtpu: 0.0.40
codegen_flags: <defaults>
</compile_context>

<pallas_src>
import functools
import math

import jax
import jax.numpy as jnp
from jax.experimental import pallas as pl
from jax.experimental.pallas import tpu as pltpu


# ---------------------------------------------------------------------------
# Kernel: one graph-conv layer, one adjacency row block per grid step.
#   o[i*TM:(i+1)*TM, :] = act( (adj[i*TM:(i+1)*TM, :] @ h) @ W )
# ---------------------------------------------------------------------------
def _gcn_layer_kernel(h_ref, adj_ref, w_ref, o_ref, *, relu):
    # Aggregation: (TM, N_pad) @ (N_pad, F_in), bf16 operands, f32 accumulate.
    agg = jnp.dot(adj_ref[...], h_ref[...], preferred_element_type=jnp.float32)
    # Feature transform: (TM, F_in) @ (F_in, F_out), bf16 in / f32 accumulate.
    out = jnp.dot(agg.astype(jnp.bfloat16), w_ref[...],
                  preferred_element_type=jnp.float32)
    if relu:
        out = jnp.maximum(out, 0.0)
    o_ref[...] = out.astype(o_ref.dtype)


def _gcn_layer(h, adj, w, *, relu, out_dtype, tm):
    """One tiled graph-conv layer. h:(N_pad,F_in) adj:(N_pad,N_pad) w:(F_in,F_out)."""
    n_pad, f_in = h.shape
    f_out = w.shape[1]
    assert n_pad % tm == 0 and f_in % 128 == 0 and f_out % 128 == 0

    # VMEM budget: double-buffered adj slab + resident h, W, and output block.
    out_bytes = jnp.dtype(out_dtype).itemsize
    needed = (2 * tm * n_pad * 2          # adj row slab (bf16), double-buffered
              + 2 * n_pad * f_in * 2      # resident node features (bf16)
              + 2 * f_in * f_out * 2      # resident weights (bf16)
              + 2 * tm * f_out * out_bytes)  # output block
    vmem_limit = int(min(max(2 * needed + (8 << 20), 32 << 20), 48 << 20))

    kernel = functools.partial(_gcn_layer_kernel, relu=relu)
    return pl.pallas_call(
        kernel,
        out_shape=jax.ShapeDtypeStruct((n_pad, f_out), out_dtype),
        grid_spec=pltpu.PrefetchScalarGridSpec(
            num_scalar_prefetch=0,
            grid=(n_pad // tm,),
            in_specs=[
                pl.BlockSpec((n_pad, f_in), lambda i: (0, 0)),   # h: resident
                pl.BlockSpec((tm, n_pad), lambda i: (i, 0)),     # adj: streamed
                pl.BlockSpec((f_in, f_out), lambda i: (0, 0)),   # W: resident
            ],
            out_specs=pl.BlockSpec((tm, f_out), lambda i: (i, 0)),
        ),
        compiler_params=pltpu.CompilerParams(
            dimension_semantics=("parallel",),
            vmem_limit_bytes=vmem_limit,
        ),
    )(h, adj, w)


# ---------------------------------------------------------------------------
# Wrapper: pad to lane-dense / row-block-aligned shapes, run 3 layers, slice.
# ---------------------------------------------------------------------------
def _round_up(v, m):
    return ((v + m - 1) // m) * m


def _pad2d(a, rows, cols, dtype):
    r, c = a.shape
    return jnp.pad(a, ((0, rows - r), (0, cols - c))).astype(dtype)


def gcn3_forward(x, adj, w1, w2, w3, *, tm=128):
    n, in_dim = x.shape
    hid_dim = w1.shape[1]
    out_dim = w3.shape[1]

    n_pad = _round_up(n, tm)
    f_in = _round_up(in_dim, 128)
    f_hid = _round_up(hid_dim, 128)
    f_out = _round_up(out_dim, 128)

    # Cast to bf16 once in HBM (halves adj streaming bytes); zero padding is exact.
    x_p = _pad2d(x, n_pad, f_in, jnp.bfloat16)
    adj_p = _pad2d(adj, n_pad, n_pad, jnp.bfloat16)
    w1_p = _pad2d(w1, f_in, f_hid, jnp.bfloat16)
    w2_p = _pad2d(w2, f_hid, f_hid, jnp.bfloat16)
    w3_p = _pad2d(w3, f_hid, f_out, jnp.bfloat16)

    h1 = _gcn_layer(x_p, adj_p, w1_p, relu=True, out_dtype=jnp.bfloat16, tm=tm)
    h2 = _gcn_layer(h1, adj_p, w2_p, relu=True, out_dtype=jnp.bfloat16, tm=tm)
    y = _gcn_layer(h2, adj_p, w3_p, relu=False, out_dtype=jnp.float32, tm=tm)

    return y[:n, :out_dim]


# ---------------------------------------------------------------------------
# Parameter init matching GraphConvolution3.reset_parameters (weights only;
# bias is unused by the forward pass).
# ---------------------------------------------------------------------------
def init_params(key, in_dim, hid_dim, out_dim):
    ks = jax.random.split(key, 3)

    def u(k, d_in, d_out):
        stdv = 1.0 / math.sqrt(d_out)
        return jax.random.uniform(k, (d_in, d_out), jnp.float32, -stdv, stdv)

    w1 = u(ks[0], in_dim, hid_dim)
    w2 = u(ks[1], hid_dim, hid_dim)
    w3 = u(ks[2], hid_dim, out_dim)
    return w1, w2, w3


if __name__ == "__main__":
    key = jax.random.PRNGKey(0)
    k_x, k_adj, k_w = jax.random.split(key, 3)

    # Small logical shapes (padded internally to 128-lane / 128-row tiles;
    # N=200 -> N_pad=256 gives a 2-step row-block grid per layer).
    N, IN_DIM, HID_DIM, OUT_DIM = 200, 8, 32, 8

    x = jax.random.normal(k_x, (N, IN_DIM), dtype=jnp.float32)
    a = jax.random.uniform(k_adj, (N, N), dtype=jnp.float32)
    adj = 0.5 * (a + a.T)  # symmetric-ish dense "adjacency"

    w1, w2, w3 = init_params(k_w, IN_DIM, HID_DIM, OUT_DIM)

    out = gcn3_forward(x, adj, w1, w2, w3)
    jax.block_until_ready(out)

    # Pure-f32 reference of the same math (kernel uses bf16 MXU inputs with
    # f32 accumulation, so compare with a relative-to-max tolerance).
    ref = jnp.maximum(adj @ (x @ w1), 0.0)
    ref = jnp.maximum(adj @ (ref @ w2), 0.0)
    ref = adj @ (ref @ w3)

    rel_err = jnp.max(jnp.abs(out - ref)) / (jnp.max(jnp.abs(ref)) + 1e-6)
    assert out.shape == (N, OUT_DIM), out.shape
    assert rel_err < 5e-2, f"mismatch vs reference: rel_err={rel_err}"

    print("KERNEL_OK")
</pallas_src>

<mosaic_0001>
module attributes {stable_mosaic.version = 11 : i64} {
  func.func @_gcn_layer_kernel(%arg0: i32, %arg1: memref<256x128xbf16, #tpu.memory_space<vmem>>, %arg2: memref<128x256xbf16, #tpu.memory_space<vmem>>, %arg3: memref<128x128xbf16, #tpu.memory_space<vmem>>, %arg4: memref<128x128xbf16, #tpu.memory_space<vmem>>) attributes {dimension_semantics = [#tpu.dimension_semantics<parallel>], iteration_bounds = array<i64: 2>, scalar_prefetch = 0 : i64, scratch_operands = 0 : i64, tpu.core_type = #tpu.core_type<tc>, window_params = [{pipeline_mode = #tpu.pipeline_mode<synchronous>, transform_indices = @transform_0, window_bounds = array<i64: 256, 128>}, {transform_indices = @transform_1, window_bounds = array<i64: 128, 256>}, {pipeline_mode = #tpu.pipeline_mode<synchronous>, transform_indices = @transform_2, window_bounds = array<i64: 128, 128>}, {transform_indices = @transform_3, window_bounds = array<i64: 128, 128>}]} {
    %c0 = arith.constant 0 : index
    %c0_0 = arith.constant 0 : index
    %0 = vector.load %arg2[%c0, %c0_0] : memref<128x256xbf16, #tpu.memory_space<vmem>>, vector<128x256xbf16>
    %c0_1 = arith.constant 0 : index
    %c0_2 = arith.constant 0 : index
    %1 = vector.load %arg1[%c0_1, %c0_2] : memref<256x128xbf16, #tpu.memory_space<vmem>>, vector<256x128xbf16>
    %cst = arith.constant dense<0.000000e+00> : vector<128x128xf32>
    %2 = tpu.matmul %0, %1, %cst {dimension_numbers = #tpu.dot_dimension_numbers<[1], [0], [0], [1], [0, 0, 1, 1], [], []>} : vector<128x256xbf16>, vector<256x128xbf16>, vector<128x128xf32> -> vector<128x128xf32>
    %3 = arith.truncf %2 : vector<128x128xf32> to vector<128x128xbf16>
    %c0_3 = arith.constant 0 : index
    %c0_4 = arith.constant 0 : index
    %4 = vector.load %arg3[%c0_3, %c0_4] : memref<128x128xbf16, #tpu.memory_space<vmem>>, vector<128x128xbf16>
    %cst_5 = arith.constant dense<0.000000e+00> : vector<128x128xf32>
    %5 = tpu.matmul %3, %4, %cst_5 {dimension_numbers = #tpu.dot_dimension_numbers<[1], [0], [0], [1], [0, 0, 1, 1], [], []>} : vector<128x128xbf16>, vector<128x128xbf16>, vector<128x128xf32> -> vector<128x128xf32>
    %cst_6 = arith.constant 0.000000e+00 : f32
    %6 = vector.broadcast %cst_6 : f32 to vector<128x128xf32>
    %7 = arith.maximumf %5, %6 : vector<128x128xf32>
    %8 = arith.truncf %7 : vector<128x128xf32> to vector<128x128xbf16>
    %c0_7 = arith.constant 0 : index
    %c0_8 = arith.constant 0 : index
    %9 = vector.load %arg4[%c0_7, %c0_8] : memref<128x128xbf16, #tpu.memory_space<vmem>>, vector<128x128xbf16>
    tpu.vector_store %arg4[%c0_7, %c0_8], %8 {strides = array<i32>} : memref<128x128xbf16, #tpu.memory_space<vmem>>, vector<128x128xbf16>,
    return
  }
  func.func @transform_0(%arg0: i32) -> (i32, i32) {
    %c0_i32 = arith.constant 0 : i32
    %c0_i32_0 = arith.constant 0 : i32
    %c0_i32_1 = arith.constant 0 : i32
    return %c0_i32, %c0_i32_0 : i32, i32
  }
  func.func @transform_1(%arg0: i32) -> (i32, i32) {
    %c0_i32 = arith.constant 0 : i32
    %c0_i32_0 = arith.constant 0 : i32
    return %arg0, %c0_i32 : i32, i32
  }
  func.func @transform_2(%arg0: i32) -> (i32, i32) {
    %c0_i32 = arith.constant 0 : i32
    %c0_i32_0 = arith.constant 0 : i32
    %c0_i32_1 = arith.constant 0 : i32
    return %c0_i32, %c0_i32_0 : i32, i32
  }
  func.func @transform_3(%arg0: i32) -> (i32, i32) {
    %c0_i32 = arith.constant 0 : i32
    %c0_i32_0 = arith.constant 0 : i32
    return %arg0, %c0_i32 : i32, i32
  }
}

</mosaic_0001>

<bundles_post_ra>
// kernel: tpu_custom_call.1
= control target key start
LH: loop header
LB: loop body
LE: loop exit
PB: predicated region body
PF: predicated region fallthrough
CT: control target
= control target key end

     0   :  { %8 = vsyncpa [#allocation3], 0  ;;  %s1582_s0 = inlined_call_operand.hbm [shape: bf16[256,128], index: 0, kind: input, shape index: {}]   ;;  %s1583_s1 = inlined_call_operand.hbm [shape: bf16[256,256], index: 1, kind: input, shape index: {}]   ;;  %s1584_s2 = inlined_call_operand.hbm [shape: bf16[128,128], index: 2, kind: input, shape index: {}]   ;;  %s1585_s3 = inlined_call_operand.hbm [shape: bf16[256,128], index: 3, kind: output, shape index: {}]  }
   0x1   :  { %9 = vsyncpa [#allocation6], 0 }
   0x2   :  { %11 = vsyncpa [#allocation6 + $0x1], 0 }
   0x3   :  { %12 = vsyncpa [#allocation4], 0 }
   0x4   :  { %14 = vsyncpa [#allocation4 + $0x1], 0  ;;  %s1388_s12 = smov 0   ;;  %s1390_s13 = smov 0  }
   0x5   :  { %s1392_s14 = smov 0   ;;  %s1394_s15 = smov 0  }
   0x6 LB: > { %s1409_s16 = sadd.s32 4294967295, %s1358_s15   ;;  %s828_s17 = sadd.s32 4294967294, %s1358_s15   ;;  %s1358_s15 = sphi %s1394_s15, %s1595_s15   ;;  %s1354_s14 = sphi %s1392_s14, %s1594_s14   ;;  %s1350_s13 = sphi %s1390_s13, %s1593_s13   ;;  %s1346_s12 = sphi %s1388_s12, %s1592_s12  }
   0x7   : > { %p61_p0 = scmp.ne.s32.totalorder %s1350_s13, %s1346_s12  ;;  %p62_p1 = scmp.eq.s32.totalorder %s1409_s16, 0 }
   0x8   : > { %p106_p2 = scmp.eq.s32.totalorder %s1409_s16, 1  ;;  %p112_p3 = scmp.eq.s32.totalorder %s828_s17, 1 }
   0x9   : > { %p1418_p4 = por %p62_p1, %p61_p0  ;;  %p829_p5 = scmp.ge.s32.totalorder %s1358_s15, 1 }
   0xa   : > { %p1423_p6 = por %p112_p3, %p61_p0  ;;  %p119_p7 = scmp.lt.s32.totalorder %s1358_s15, 3 }
   0xb   : > { %s144_s23 = sshll.u32 %s1584_s2, 4  ;;  %s1360_s24 = smov [#allocation7]   ;;  %s145_s23 = int_to_ptr.hbm [resolvable:$true] %s144_s23 }
   0xc   : > { %p1428_p8 = pnand %p829_p5, %p119_p7  ;;  %s146_s25 = sshll.u32 %s1360_s24, 4  ;;  %s147_s25 = int_to_ptr.vmem [resolvable:$true] %s146_s25 }
   0xd   : > { %s130_s28 = sshll.u32 %s1582_s0, 4  ;;  %s1361_s29 = smov 64   ;;  %s131_s28 = int_to_ptr.hbm [resolvable:$true] %s130_s28 }
   0xe   : > { %p1133_p9 = pneg %p1428_p8  ;;  %s1362_s30 = smov 4  }
   0xf   : > { %s1363_s4 = smov [#allocation2]   ;;  %s1444_s6 = sadd.s32 1, %s1358_s15  }
  0x10   : > { %p1134_p11 = pnand %p1133_p9, %p62_p1  ;;  %s132_s5 = sshll.u32 %s1363_s4, 4  ;;  %s133_s5 = int_to_ptr.vmem [resolvable:$true] %s132_s5 }
  0x11   : > { %s48_s7 = sadd.s32 1, %s1354_s14  ;;  %s45_s8 = ssub.s32 %s1358_s15, %s1444_s6 }
  0x12   : > { %1139 = dma.hbm_to_vmem [thread:$0]  (!%p1134_p11), %s145_s23, 1024, %s147_s25, [#allocation6], %s1361_s29, %s1361_s29, %s1362_s30  }
  0x13   : > { %1136 = dma.hbm_to_vmem [thread:$0]  (!%p1134_p11), %s131_s28, 2048, %s133_s5, [#allocation3], %s1361_s29, %s1361_s29, %s1362_s30  }
  0x14   : > { %p55_p12 = scmp.ne.s32.totalorder %s1354_s14, %s1350_s13  ;;  %p46_p13 = scmp.eq.s32.totalorder %s45_s8, 0 }
  0x15   : > { %p56_p0 = scmp.eq.s32.totalorder %s1358_s15, 0  ;;  %p1150_p5 = scmp.lt.s32.totalorder %s1358_s15, 2 }
  0x16   : > { %p1454_p3 = por %p106_p2, %p55_p12  ;;  %s160_s11 = sand.u32 1, %s1358_s15  }
  0x17   : > { %s1460_s10 = scalar_select %p46_p13, %s1354_s14, %s48_s7  }
  0x18   : > { %p57_p7 = por %p56_p0, %p55_p12  ;;  %s162_s17 = sand.u32 1, %s1354_s14  }
  0x19   : > { %s833_s21 = sshll.u32 %s162_s17, 7  ;;  %s1008_s22 = sshll.u32 %s1358_s15, 7 }
  0x1a   : > { %s170_s25 = scalar_lea.hbm %s1583_s1, %s1008_s22  ;;  %s164_s27 = scalar_lea.vmem [#allocation5], %s833_s21 }
  0x1b   : > { %s171_s26 = sshll.u32 %s170_s25, 4  ;;  %s173_s28 = sshll.u32 %s164_s27, 4  ;;  %s172_s26 = int_to_ptr.hbm [resolvable:$true] %s171_s26  ;;  %s174_s28 = int_to_ptr.vmem [resolvable:$true] %s173_s28 }
  0x1c   : > { %p1470_p2 = pnand %p1150_p5, %p57_p7  ;;  %s161_s30 = scalar_lea.sflag [#allocation6], %s160_s11 }
  0x1d   : > { %s1254_s4 = sshra.s32 %s172_s26, 4  ;;  %s1261_s17 = scalar_lea.hbm %s1583_s1, 256  ;;  %s1255_s4 = int_to_ptr.hbm [resolvable:$true] %s1254_s4 }
  0x1e   : > { %s1256_s5 = scalar_lea.hbm %s1255_s4, 128  ;;  %p1258_p11 = pneg %p1470_p2 }
  0x1f   : > { %p1257_p9 = scmp.ne.s32.totalorder %s1255_s4, %s1256_s5  ;;  %p1262_p0 = scmp.lt.s32.totalorder %s1255_s4, %s1583_s1 }
  0x20   : > { %p1263_p5 = scmp.lt.s32.totalorder %s1261_s17, %s1256_s5 }
  0x21   : > { %p1259_p12 = pnand %p1258_p11, %p1257_p9 }
  0x22   : > { %p1264_p7 = por %p1263_p5, %p1262_p0 }
  0x23   : > { %p1260_p13 = pneg %p1259_p12 }
  0x25   : > { %p1265_p10 = pnand %p1264_p7, %p1260_p13 }
  0x27   : > { %1268 = shalt.err (!%p1265_p10)
}
  0x28   : > { %s1364_s11 = smov 128   ;;  %s1365_s23 = smov 8  }
  0x29   : > { %1143 = dma.hbm_to_vmem [thread:$0]  (!%p1470_p2), %s172_s26, 2048, %s174_s28, %s161_s30, %s1364_s11, %s1364_s11, %s1365_s23  }
  0x2a   : > { %185 = sbr.rel (%p1428_p8) target bundleno = 453 (0x1c5), region = 32 }
  0x2f   : > { %1329 = dma.done.wait (%p62_p1), [#allocation3], 2048  }
  0x30   : > { %1331 = vsyncadd (%p62_p1), [#allocation3], 4294965248  ;;  %s192_s24 = sand.u32 1, %s1409_s16   ;;  %s1492_s25 = sand.u32 1, %s1350_s13  }
  0x31   : > { %s839_s27 = sshll.u32 %s1492_s25, 7  ;;  %s193_s4 = scalar_lea.sflag [#allocation6], %s192_s24 }
  0x32   : > { %s1495_s29 = scalar_lea.vmem [#allocation5], %s839_s27 }
  0x33   : > { %1333 = dma.done.wait (%p1418_p4), %s193_s4, 2048  }
  0x34   : > { %1335 = vsyncadd (%p1418_p4), %s193_s4, 4294965248 }
  0x35   : > { %1337 = dma.done.wait (%p62_p1), [#allocation6], 1024  }
  0x36   : > { %1339 = vsyncadd (%p62_p1), [#allocation6], 4294966272  ;;  %v1032_v0 = vld [vmem:[#allocation2 + $0x38] sm:$0xff]  ;;  %v1031_v2 = vld [vmem:[#allocation2 + $0x30] sm:$0xff]  ;;  %s841_s18 = sshll.u32 %s1492_s25, 6  ;;  %s1049_s26 = sshll.u32 %s1409_s16, 6 }
  0x37   : > { %v1040_v1 = vld [vmem:[#allocation2 + $0x78] sm:$0xff]  ;;  %451 = vmatpush.bf16.msra.mxu0 %v1032_v0  ;;  %1097 = vmatpush.bf16.msra.mxu3 %v1032_v0  ;;  %v1039_v3 = vld [vmem:[#allocation2 + $0x70] sm:$0xff]  ;;  %v1030_v4 = vld [vmem:[#allocation2 + $0x28] sm:$0xff]  ;;  %s1538_s20 = scalar_lea.vmem [#allocation8], %s841_s18  ;;  %s730_s5 = scalar_lea.hbm %s1585_s3, %s1049_s26 }
  0x38   : > { %500 = vmatpush.bf16.msra.mxu1 %v1040_v1  ;;  %v1038_v5 = vld [vmem:[#allocation2 + $0x68] sm:$0xff]  ;;  %v1029_v6 = vld [vmem:[#allocation2 + $0x20] sm:$0xff]  ;;  %v1028_v8 = vld [vmem:[#allocation2 + $0x18] sm:$0xff]  ;;  %s731_s7 = sshll.u32 %s1538_s20, 4  ;;  %s733_s8 = sshll.u32 %s730_s5, 4  ;;  %s732_s7 = int_to_ptr.vmem [resolvable:$true] %s731_s7  ;;  %s734_s8 = int_to_ptr.hbm [resolvable:$true] %s733_s8 }
  0x39   : > { %v1037_v7 = vld [vmem:[#allocation2 + $0x60] sm:$0xff]  ;;  %v1036_v9 = vld [vmem:[#allocation2 + $0x58] sm:$0xff]  ;;  %v1027_v10 = vld [vmem:[#allocation2 + $0x10] sm:$0xff]  ;;  %s719_s17 = scalar_lea.sflag [#allocation4], %s1492_s25  ;;  %s1298_s21 = sshra.s32 %s734_s8, 4  ;;  %s1299_s21 = int_to_ptr.hbm [resolvable:$true] %s1298_s21 }
  0x3a   : > { %v1035_v11 = vld [vmem:[#allocation2 + $0x50] sm:$0xff]  ;;  %v1026_v12 = vld [vmem:[#allocation2 + $0x8] sm:$0xff]  ;;  %v1025_v14 = vld [vmem:[#allocation2] sm:$0xff]  ;;  %s1300_s22 = scalar_lea.hbm %s1299_s21, 64  ;;  %s1304_s23 = scalar_lea.hbm %s1585_s3, 128 }
  0x3b   : > { %452 = vmatpush.bf16.msra.mxu0 %v1031_v2  ;;  %1098 = vmatpush.bf16.msra.mxu3 %v1031_v2  ;;  %v1034_v13 = vld [vmem:[#allocation2 + $0x48] sm:$0xff]  ;;  %v844_v15 = vld [vmem:[%s1495_s29] sm:$0xf]  ;;  %v1009_v20 = vld [vmem:[%s1495_s29 + $0x4] sm:$0xf]  ;;  %p1301_p1 = scmp.ne.s32.totalorder %s1299_s21, %s1300_s22  ;;  %p1305_p10 = scmp.lt.s32.totalorder %s1299_s21, %s1585_s3 }
  0x3c   : > { %501 = vmatpush.bf16.msra.mxu1 %v1039_v3  ;;  %v1010_v16 = vld [vmem:[%s1495_s29 + $0x4] sm:$0xf0]  ;;  %v892_v17 = vld [vmem:[%s1495_s29 + $0x60] sm:$0xf]  ;;  %v846_v21 = vld [vmem:[%s1495_s29 + $0x8] sm:$0xf0]  ;;  %p1306_p2 = scmp.lt.s32.totalorder %s1304_s23, %s1300_s22 }
  0x3d   : > { %v1022_v18 = vld [vmem:[%s1495_s29 + $0x64] sm:$0xf0]  ;;  %v1033_v19 = vld [vmem:[#allocation2 + $0x40] sm:$0xff]  ;;  %v845_v22 = vor.u32 %v1010_v16, %v844_v15  ;;  %v849_v24 = vor.u32 %v1009_v20, %v846_v21  ;;  %v852_v25 = vld [vmem:[%s1495_s29 + $0x10] sm:$0xf]  ;;  %p1302_p4 = pnand %p1301_p1, %p1454_p3 }
  0x3e   : > { %v893_v23 = vor.u32 %v1022_v18, %v892_v17  ;;  %v1012_v26 = vld [vmem:[%s1495_s29 + $0x14] sm:$0xf0]  ;;  %v900_v27 = vld [vmem:[%s1495_s29 + $0x70] sm:$0xf]  ;;  %v1011_v29 = vld [vmem:[%s1495_s29 + $0x14] sm:$0xf]  ;;  %p1307_p9 = por %p1306_p2, %p1305_p10 }
  0x3f   : > { %453 = vmatpush.bf16.msra.mxu0 %v1030_v4  ;;  %1099 = vmatpush.bf16.msra.mxu3 %v1030_v4  ;;  %v1024_v28 = vld [vmem:[%s1495_s29 + $0x74] sm:$0xf0]  ;;  %v854_v30 = vld [vmem:[%s1495_s29 + $0x18] sm:$0xf0]  ;;  %v853_v31 = vor.u32 %v1012_v26, %v852_v25  ;;  %v860_v34 = vld [vmem:[%s1495_s29 + $0x20] sm:$0xf]  ;;  %p1303_p8 = pneg %p1302_p4 }
  0x40   : > { %502 = vmatpush.bf16.msra.mxu1 %v1038_v5  ;;  %v901_v32 = vor.u32 %v1024_v28, %v900_v27  ;;  %v857_v33 = vor.u32 %v1011_v29, %v854_v30  ;;  %v1014_v35 = vld [vmem:[%s1495_s29 + $0x24] sm:$0xf0]  ;;  %v1021_v36 = vld [vmem:[%s1495_s29 + $0x64] sm:$0xf]  ;;  %v894_v37 = vld [vmem:[%s1495_s29 + $0x68] sm:$0xf0] }
  0x41   : > { %v1013_v38 = vld [vmem:[%s1495_s29 + $0x24] sm:$0xf]  ;;  %v862_v39 = vld [vmem:[%s1495_s29 + $0x28] sm:$0xf0]  ;;  %v861_v40 = vor.u32 %v1014_v35, %v860_v34  ;;  %v897_v41 = vor.u32 %v1021_v36, %v894_v37  ;;  %v868_v43 = vld [vmem:[%s1495_s29 + $0x30] sm:$0xf]  ;;  %p1308_p11 = pnand %p1307_p9, %p1303_p8 }
  0x42   : > { %v865_v42 = vor.u32 %v1013_v38, %v862_v39  ;;  %v1016_v44 = vld [vmem:[%s1495_s29 + $0x34] sm:$0xf0]  ;;  %v1023_v45 = vld [vmem:[%s1495_s29 + $0x74] sm:$0xf]  ;;  %v902_v46 = vld [vmem:[%s1495_s29 + $0x78] sm:$0xf0] }
  0x43   : > { %454 = vmatpush.bf16.msra.mxu0 %v1029_v6  ;;  %1100 = vmatpush.bf16.msra.mxu3 %v1029_v6  ;;  %v1015_v47 = vld [vmem:[%s1495_s29 + $0x34] sm:$0xf]  ;;  %v870_v48 = vld [vmem:[%s1495_s29 + $0x38] sm:$0xf0]  ;;  %v869_v49 = vor.u32 %v1016_v44, %v868_v43  ;;  %v905_v50 = vor.u32 %v1023_v45, %v902_v46  ;;  %v1046_v54 = vld [vmem:[#allocation7 + $0x28] sm:$0xff] }
  0x44   : > { %503 = vmatpush.bf16.msra.mxu1 %v1037_v7  ;;  %v873_v51 = vor.u32 %v1015_v47, %v870_v48  ;;  %v1048_v52 = vld [vmem:[#allocation7 + $0x38] sm:$0xff]  ;;  %v1047_v53 = vld [vmem:[#allocation7 + $0x30] sm:$0xff]  ;;  %v876_v55 = vld [vmem:[%s1495_s29 + $0x40] sm:$0xf] }
  0x45   : > { %621 = vmatpush.bf16.msra.mxu2 %v1048_v52  ;;  %v1018_v56 = vld [vmem:[%s1495_s29 + $0x44] sm:$0xf0]  ;;  %v1017_v57 = vld [vmem:[%s1495_s29 + $0x44] sm:$0xf]  ;;  %v878_v58 = vld [vmem:[%s1495_s29 + $0x48] sm:$0xf0] }
  0x46   : > { %v1045_v59 = vld [vmem:[#allocation7 + $0x20] sm:$0xff]  ;;  %v877_v60 = vor.u32 %v1018_v56, %v876_v55  ;;  %v881_v61 = vor.u32 %v1017_v57, %v878_v58  ;;  %v1044_v62 = vld [vmem:[#allocation7 + $0x18] sm:$0xff]  ;;  %v884_v63 = vld [vmem:[%s1495_s29 + $0x50] sm:$0xf] }
  0x47   : > { %455 = vmatpush.bf16.msra.mxu0 %v1028_v8  ;;  %1101 = vmatpush.bf16.msra.mxu3 %v1028_v8  ;;  %v1020_v0 = vld [vmem:[%s1495_s29 + $0x54] sm:$0xf0]  ;;  %v886_v2 = vld [vmem:[%s1495_s29 + $0x58] sm:$0xf0]  ;;  %v1042_v6 = vld [vmem:[#allocation7 + $0x8] sm:$0xff] }
  0x48   : > { %504 = vmatpush.bf16.msra.mxu1 %v1036_v9 }
  0x49   : > { %622 = vmatpush.bf16.msra.mxu2 %v1047_v53 }
  0x4b   : > { %456 = vmatpush.bf16.msra.mxu0 %v1027_v10  ;;  %1102 = vmatpush.bf16.msra.mxu3 %v1027_v10 }
  0x4c   : > { %505 = vmatpush.bf16.msra.mxu1 %v1035_v11 }
  0x4d   : > { %623 = vmatpush.bf16.msra.mxu2 %v1046_v54 }
  0x4f   : > { %457 = vmatpush.bf16.msra.mxu0 %v1026_v12  ;;  %1103 = vmatpush.bf16.msra.mxu3 %v1026_v12 }
  0x50   : > { %506 = vmatpush.bf16.msra.mxu1 %v1034_v13 }
  0x51   : > { %624 = vmatpush.bf16.msra.mxu2 %v1045_v59 }
  0x53   : > { %458 = vmatpush.bf16.msra.mxu0 %v1025_v14  ;;  %1104 = vmatpush.bf16.msra.mxu3 %v1025_v14 }
  0x54   : > { %507 = vmatpush.bf16.msra.mxu1 %v1033_v19 }
  0x55   : > { %625 = vmatpush.bf16.msra.mxu2 %v1044_v62 }
  0x56   : > { %459 = vmatmul.bf16.vlgmr.msra.gmra.mxu0 %v845_v22  ;;  %489 = vmatmul.bf16.vlgmr.msra.gmra.mxu3 %v893_v23 }
  0x57   : > { %1105 = vmatpush.bf16.msrb.mxu3 %v1040_v1  ;;  %508 = vmatmul.bf16.vlgmr.msra.gmra.mxu1 %v849_v24  ;;  %v1019_v1 = vld [vmem:[%s1495_s29 + $0x54] sm:$0xf] }
  0x58   : > { %v889_v4 = vor.u32 %v1019_v1, %v886_v2 }
  0x5b   : > { %1106 = vmatpush.bf16.msrb.mxu3 %v1039_v3  ;;  %v885_v3 = vor.u32 %v1020_v0, %v884_v63 }
  0x5f   : > { %1107 = vmatpush.bf16.msrb.mxu3 %v1038_v5  ;;  %v1043_v5 = vld [vmem:[#allocation7 + $0x10] sm:$0xff] }
  0x60   : > { %626 = vmatpush.bf16.msra.mxu2 %v1043_v5 }
  0x63   : > { %1108 = vmatpush.bf16.msrb.mxu3 %v1037_v7  ;;  %v1041_v7 = vld [vmem:[#allocation7] sm:$0xff] }
  0x64   : > { %627 = vmatpush.bf16.msra.mxu2 %v1042_v6 }
  0x66   : > { %464 = vmatmul.bf16.gmra.mxu0 %v853_v31  ;;  %494 = vmatmul.bf16.gmra.mxu3 %v901_v32 }
  0x67   : > { %1109 = vmatpush.bf16.msrb.mxu3 %v1036_v9  ;;  %513 = vmatmul.bf16.gmra.mxu1 %v857_v33 }
  0x68   : > { %628 = vmatpush.bf16.msra.mxu2 %v1041_v7 }
  0x6b   : > { %1110 = vmatpush.bf16.msrb.mxu3 %v1035_v11 }
  0x6f   : > { %1111 = vmatpush.bf16.msrb.mxu3 %v1034_v13 }
  0x73   : > { %1112 = vmatpush.bf16.msrb.mxu3 %v1033_v19 }
  0x76   : > { %469 = vmatmul.bf16.gmra.mxu0 %v861_v40  ;;  %538 = vmatmul.bf16.vlgmr.msrb.gmra.mxu3 %v897_v41 }
  0x77   : > { %518 = vmatmul.bf16.gmra.mxu1 %v865_v42  ;;  %1113 = vmatpush.bf16.msra.mxu3 %v1048_v52 }
  0x7b   : > { %1114 = vmatpush.bf16.msra.mxu3 %v1047_v53 }
  0x7f   : > { %1115 = vmatpush.bf16.msra.mxu3 %v1046_v54 }
  0x83   : > { %1116 = vmatpush.bf16.msra.mxu3 %v1045_v59 }
  0x86   : > { %474 = vmatmul.bf16.gmra.mxu0 %v869_v49  ;;  %543 = vmatmul.bf16.gmra.mxu3 %v905_v50 }
  0x87   : > { %523 = vmatmul.bf16.gmra.mxu1 %v873_v51  ;;  %1117 = vmatpush.bf16.msra.mxu3 %v1044_v62 }
  0x8b   : > { %1118 = vmatpush.bf16.msra.mxu3 %v1043_v5 }
  0x8f   : > { %1119 = vmatpush.bf16.msra.mxu3 %v1042_v6 }
  0x93   : > { %1120 = vmatpush.bf16.msra.mxu3 %v1041_v7 }
  0x96   : > { %479 = vmatmul.bf16.gmra.mxu0 %v877_v60 }
  0x97   : > { %528 = vmatmul.bf16.gmra.mxu1 %v881_v61 }
  0xa6   : > { %484 = vmatmul.bf16.gmra.mxu0 %v885_v3 }
  0xa7   : > { %533 = vmatmul.bf16.gmra.mxu1 %v889_v4 }
  0xd3   : > { %v460_v8 = vpop.f32.mrf.mxu0 }
  0xd4   : > { %v509_v9 = vpop.f32.mrf.mxu1 }
  0xd5   : > { %v510_v13 = vadd.f32 %v509_v9, %v460_v8 }
  0xd9   : > { %v490_v10 = vpop.f32.mrf.mxu3 }
  0xdb   : > { %v462_v11 = vpop.f32.mrf.mxu0 }
  0xdc   : > { %v511_v12 = vpop.f32.mrf.mxu1 }
  0xdd   : > { %v512_v14 = vadd.f32 %v511_v12, %v462_v11 }
  0xdf   : > { %v549_v15 = vpack.c.bf16 %v512_v14, %v510_v13 }
  0xe1   : > { %629 = vmatmul.bf16.vlgmr.msra.gmra.mxu2 %v549_v15  ;;  %v492_v16 = vpop.f32.mrf.mxu3 }
  0xe3   : > { %v465_v17 = vpop.f32.mrf.mxu0 }
  0xe4   : > { %v514_v18 = vpop.f32.mrf.mxu1 }
  0xe5   : > { %v515_v22 = vadd.f32 %v514_v18, %v465_v17 }
  0xe9   : > { %v495_v19 = vpop.f32.mrf.mxu3 }
  0xeb   : > { %v467_v20 = vpop.f32.mrf.mxu0 }
  0xec   : > { %v516_v21 = vpop.f32.mrf.mxu1 }
  0xed   : > { %v517_v23 = vadd.f32 %v516_v21, %v467_v20 }
  0xef   : > { %v550_v24 = vpack.c.bf16 %v517_v23, %v515_v22 }
  0xf1   : > { %634 = vmatmul.bf16.gmra.mxu2 %v550_v24  ;;  %v497_v25 = vpop.f32.mrf.mxu3 }
  0xf3   : > { %v470_v26 = vpop.f32.mrf.mxu0 }
  0xf4   : > { %v519_v27 = vpop.f32.mrf.mxu1 }
  0xf5   : > { %v520_v31 = vadd.f32 %v519_v27, %v470_v26 }
  0xf9   : > { %v539_v28 = vpop.f32.mrf.mxu3 }
  0xfa   : > { %v540_v35 = vadd.f32 %v539_v28, %v490_v10 }
  0xfb   : > { %v472_v29 = vpop.f32.mrf.mxu0 }
  0xfc   : > { %v521_v30 = vpop.f32.mrf.mxu1 }
  0xfd   : > { %v522_v32 = vadd.f32 %v521_v30, %v472_v29 }
  0xff   : > { %v551_v33 = vpack.c.bf16 %v522_v32, %v520_v31 }
 0x101   : > { %639 = vmatmul.bf16.gmra.mxu2 %v551_v33  ;;  %v541_v34 = vpop.f32.mrf.mxu3 }
 0x102   : > { %v542_v36 = vadd.f32 %v541_v34, %v492_v16 }
 0x103   : > { %v475_v37 = vpop.f32.mrf.mxu0 }
 0x104   : > { %v555_v38 = vpack.c.bf16 %v542_v36, %v540_v35  ;;  %v524_v39 = vpop.f32.mrf.mxu1 }
 0x105   : > { %v525_v43 = vadd.f32 %v524_v39, %v475_v37 }
 0x106   : > { %659 = vmatmul.bf16.vlgmr.msra.gmra.mxu3 %v555_v38 }
 0x109   : > { %v544_v40 = vpop.f32.mrf.mxu3 }
 0x10a   : > { %v545_v47 = vadd.f32 %v544_v40, %v495_v19 }
 0x10b   : > { %v477_v41 = vpop.f32.mrf.mxu0 }
 0x10c   : > { %v526_v42 = vpop.f32.mrf.mxu1 }
 0x10d   : > { %v527_v44 = vadd.f32 %v526_v42, %v477_v41 }
 0x10f   : > { %v552_v45 = vpack.c.bf16 %v527_v44, %v525_v43 }
 0x111   : > { %644 = vmatmul.bf16.gmra.mxu2 %v552_v45  ;;  %v546_v46 = vpop.f32.mrf.mxu3 }
 0x112   : > { %v547_v48 = vadd.f32 %v546_v46, %v497_v25 }
 0x113   : > { %v480_v49 = vpop.f32.mrf.mxu0 }
 0x114   : > { %v529_v50 = vpop.f32.mrf.mxu1  ;;  %v556_v51 = vpack.c.bf16 %v547_v48, %v545_v47 }
 0x115   : > { %v530_v54 = vadd.f32 %v529_v50, %v480_v49 }
 0x116   : > { %664 = vmatmul.bf16.gmra.mxu3 %v556_v51 }
 0x11b   : > { %v482_v52 = vpop.f32.mrf.mxu0 }
 0x11c   : > { %v531_v53 = vpop.f32.mrf.mxu1 }
 0x11d   : > { %v532_v55 = vadd.f32 %v531_v53, %v482_v52 }
 0x11f   : > { %v553_v56 = vpack.c.bf16 %v532_v55, %v530_v54 }
 0x121   : > { %649 = vmatmul.bf16.gmra.mxu2 %v553_v56 }
 0x123   : > { %v485_v57 = vpop.f32.mrf.mxu0 }
 0x124   : > { %v534_v58 = vpop.f32.mrf.mxu1 }
 0x125   : > { %v535_v61 = vadd.f32 %v534_v58, %v485_v57 }
 0x12b   : > { %v487_v59 = vpop.f32.mrf.mxu0 }
 0x12c   : > { %v536_v60 = vpop.f32.mrf.mxu1 }
 0x12d   : > { %v537_v62 = vadd.f32 %v536_v60, %v487_v59 }
 0x12f   : > { %v554_v63 = vpack.c.bf16 %v537_v62, %v535_v61 }
 0x131   : > { %654 = vmatmul.bf16.gmra.mxu2 %v554_v63 }
 0x164   : > { %v630_v0 = vpop.f32.mrf.mxu2 }
 0x165   : > { %v670_v2 = vmax.f32 %v630_v0, 0.0 }
 0x16c   : > { %v632_v1 = vpop.f32.mrf.mxu2 }
 0x16d   : > { %v671_v3 = vmax.f32 %v632_v1, 0.0 }
 0x16f   : > { %v1053_v4 = vpack.c.bf16 %v671_v3, %v670_v2 }
 0x171   : > { %1054 = vst [vmem:[%s1538_s20] sm:$0xff] %v1053_v4  }
 0x174   : > { %v635_v5 = vpop.f32.mrf.mxu2 }
 0x175   : > { %v672_v7 = vmax.f32 %v635_v5, 0.0 }
 0x17c   : > { %v637_v6 = vpop.f32.mrf.mxu2 }
 0x17d   : > { %v673_v8 = vmax.f32 %v637_v6, 0.0 }
 0x17f   : > { %v1058_v9 = vpack.c.bf16 %v673_v8, %v672_v7 }
 0x181   : > { %1090 = vst [vmem:[%s1538_s20 + $0x8] sm:$0xff] %v1058_v9  }
 0x184   : > { %v640_v10 = vpop.f32.mrf.mxu2 }
 0x185   : > { %v674_v13 = vmax.f32 %v640_v10, 0.0 }
 0x189   : > { %v660_v11 = vpop.f32.mrf.mxu3 }
 0x18a   : > { %v682_v17 = vmax.f32 %v660_v11, 0.0 }
 0x18c   : > { %v642_v12 = vpop.f32.mrf.mxu2 }
 0x18d   : > { %v675_v14 = vmax.f32 %v642_v12, 0.0 }
 0x18f   : > { %v1063_v15 = vpack.c.bf16 %v675_v14, %v674_v13 }
 0x191   : > { %1091 = vst [vmem:[%s1538_s20 + $0x10] sm:$0xff] %v1063_v15   ;;  %v662_v16 = vpop.f32.mrf.mxu3 }
 0x192   : > { %v683_v18 = vmax.f32 %v662_v16, 0.0 }
 0x194   : > { %v1083_v19 = vpack.c.bf16 %v683_v18, %v682_v17  ;;  %v645_v20 = vpop.f32.mrf.mxu2 }
 0x195   : > { %v676_v23 = vmax.f32 %v645_v20, 0.0 }
 0x196   : > { %1095 = vst [vmem:[%s1538_s20 + $0x30] sm:$0xff] %v1083_v19  }
 0x199   : > { %v665_v21 = vpop.f32.mrf.mxu3 }
 0x19a   : > { %v684_v27 = vmax.f32 %v665_v21, 0.0 }
 0x19c   : > { %v647_v22 = vpop.f32.mrf.mxu2 }
 0x19d   : > { %v677_v24 = vmax.f32 %v647_v22, 0.0 }
 0x19f   : > { %v1068_v25 = vpack.c.bf16 %v677_v24, %v676_v23 }
 0x1a1   : > { %1092 = vst [vmem:[%s1538_s20 + $0x18] sm:$0xff] %v1068_v25   ;;  %v667_v26 = vpop.f32.mrf.mxu3 }
 0x1a2   : > { %v685_v28 = vmax.f32 %v667_v26, 0.0 }
 0x1a4   : > { %v1088_v29 = vpack.c.bf16 %v685_v28, %v684_v27  ;;  %v650_v30 = vpop.f32.mrf.mxu2 }
 0x1a5   : > { %v678_v32 = vmax.f32 %v650_v30, 0.0 }
 0x1a6   : > { %1096 = vst [vmem:[%s1538_s20 + $0x38] sm:$0xff] %v1088_v29  }
 0x1ac   : > { %v652_v31 = vpop.f32.mrf.mxu2 }
 0x1ad   : > { %v679_v33 = vmax.f32 %v652_v31, 0.0 }
 0x1af   : > { %v1073_v34 = vpack.c.bf16 %v679_v33, %v678_v32 }
 0x1b1   : > { %1093 = vst [vmem:[%s1538_s20 + $0x20] sm:$0xff] %v1073_v34  }
 0x1b4   : > { %v655_v35 = vpop.f32.mrf.mxu2 }
 0x1b5   : > { %v680_v37 = vmax.f32 %v655_v35, 0.0 }
 0x1bc   : > { %v657_v36 = vpop.f32.mrf.mxu2 }
 0x1bd   : > { %v681_v38 = vmax.f32 %v657_v36, 0.0 }
 0x1bf   : > { %v1078_v39 = vpack.c.bf16 %v681_v38, %v680_v37 }
 0x1c1   : > { %1094 = vst [vmem:[%s1538_s20 + $0x28] sm:$0xff] %v1078_v39  }
 0x1c2   : > { %1311 = shalt.err (!%p1308_p11)
}
 0x1c3   : > { %s1366_s25 = smov 64   ;;  %s1367_s4 = smov 4  }
 0x1c4   : > { %1131 = dma.vmem_to_hbm [thread:$0]  (%p1454_p3), %s732_s7, 1024, %s734_s8, %s719_s17, %s1366_s25, %s1366_s25, %s1367_s4  }
 0x1c5 PF: > { %s748_s29 = sand.u32 1, %s1346_s12   ;;  %p1591_p12 = scmp.ge.s32.totalorder %s1358_s15, 2 }
 0x1c6   : > { %s749_s18 = scalar_lea.sflag [#allocation4], %s748_s29 }
 0x1c7   : > { %p1145_p13 = pnand %p1591_p12, %p1423_p6 }
 0x1c9   : > { %p1146_p0 = pneg %p1145_p13 }
 0x1cb   : > { %1341 = dma.done.wait (%p1146_p0), %s749_s18, 1024  }
 0x1cc   : > { %1343 = vsyncadd (%p1146_p0), %s749_s18, 4294966272  ;;  %p17_p5 = scmp.ge.s32.totalorder %s1444_s6, 4   ;;  %s1592_s12 = smov %s1350_s13 }
 0x1cd   : > { %s1593_s13 = smov %s1354_s14  ;;  %s1594_s14 = smov %s1460_s10 }
 0x1ce   : > { %s1595_s15 = smov %s1444_s6  ;;  %19 = sbr.rel (!%p17_p5) target bundleno = 6 (0x6), region = 86 }
 0x1d3   :  { %755 = vsyncpa [#allocation3], 1 }
 0x1d4   :  { %757 = vsyncpa [#allocation3 + $0x1], 1 }
 0x1d5   :  { %758 = vsyncpa [#allocation6], 1 }
 0x1d6   :  { %760 = vsyncpa [#allocation6 + $0x1], 1 }
 0x1d7   :  { %761 = vsyncpa [#allocation4], 1 }
 0x1d8   :  { %763 = vsyncpa [#allocation4 + $0x1], 1 }

</bundles_post_ra>
